<compile_context>
chip_gen: v7x
topology: tpu7x:2x2x1
jax: 0.10.0
libtpu: 0.0.40
codegen_flags: <defaults>
</compile_context>

<pallas_src>
import jax
import jax.numpy as jnp
import numpy as np
from jax.experimental import pallas as pl
from jax.experimental.pallas import tpu as pltpu


def _make_jsd_kernel(batch_tile, vocab_tile, nv_inner, B, V,
                     need_row_mask, need_col_mask):
    n_chunks = vocab_tile // 128
    n_groups = batch_tile // 8

    def kernel(logp_ref, logq_ref, out_ref, acc_ref):
        k = pl.program_id(2)  # vocab reduction axis (last, "arbitrary")

        @pl.when(k == 0)
        def _init():
            acc_ref[...] = jnp.zeros_like(acc_ref)

        lp = logp_ref[...].astype(jnp.float32)
        lq = logq_ref[...].astype(jnp.float32)
        p = jnp.exp(lp)
        q = jnp.exp(lq)
        m = 0.5 * (p + q + 1e-12)
        logm = jnp.log(m)
        # Pointwise integrand: m*(logm - lp) + m*(logm - lq).
        term = m * (2.0 * logm - lp - lq)

        if need_col_mask:
            vblock = pl.program_id(1) * nv_inner + k
            col0 = vblock * vocab_tile
            lane = jax.lax.broadcasted_iota(jnp.int32, (batch_tile, 128), 1)

        # Fold the (batch_tile, vocab_tile) term into a (batch_tile, 128)
        # lane-partial using only vreg-aligned static slices + VPU adds.
        s = term[:, 0:128]
        if need_col_mask:
            s = jnp.where(lane + col0 < V, s, 0.0)
        for c in range(1, n_chunks):
            chunk = term[:, c * 128:(c + 1) * 128]
            if need_col_mask:
                chunk = jnp.where(lane + (col0 + c * 128) < V, chunk, 0.0)
            s = s + chunk
        if need_row_mask:
            row = jax.lax.broadcasted_iota(jnp.int32, (batch_tile, 128), 0)
            s = jnp.where(row + pl.program_id(0) * batch_tile < B, s, 0.0)

        acc_ref[...] += s

        @pl.when(k == pl.num_programs(2) - 1)
        def _finalize():
            # Fold (batch_tile, 128) to a lane-dense (8, 128) slab (VPU adds only);
            # the cross-lane reduction is deferred to the JAX wrapper.
            acc = acc_ref[...]
            slab = acc[0:8, :]
            for g in range(1, n_groups):
                slab = slab + acc[g * 8:(g + 1) * 8, :]
            out_ref[...] = slab.reshape(out_ref.shape)

    return kernel


def _round_up(x, m):
    return ((x + m - 1) // m) * m


def _pick_tile(total, cap, multiple):
    """Largest divisor of `total` that is a multiple of `multiple` and <= cap."""
    best = None
    d = multiple
    upper = min(cap, total)
    while d <= upper:
        if total % d == 0:
            best = d
        d += multiple
    return best


def _vmem_capacity_bytes():
    try:
        return int(pltpu.get_tpu_info().vmem_capacity_bytes)
    except Exception:
        return 64 << 20  # conservative fallback (v7x per-TensorCore VMEM)


_SUBLANE_MULT = {4: 8, 2: 16, 1: 32}  # dtype-dependent sublane packing


def jsd_pallas(log_p, log_q):
    assert log_p.shape == log_q.shape and log_p.ndim == 2
    B, V = log_p.shape
    itemsize = jnp.dtype(log_p.dtype).itemsize
    mult = _SUBLANE_MULT.get(itemsize, 8)

    vmem_cap = _vmem_capacity_bytes()
    budget = (vmem_cap * 3) // 4

    # --- batch tiling: zero-waste divisor of the sublane-rounded batch.
    Bp = _round_up(B, mult)
    batch_tile = _pick_tile(Bp, 256, mult) or mult

    # --- vocab tiling: biggest lane-dense tile whose estimated VMEM footprint
    #     (double-buffered inputs + f32 elementwise temporaries + accumulator) fits.
    def _footprint(vt):
        blk = batch_tile * vt
        return (4 * blk * itemsize          # 2 inputs x 2 pipeline buffers
                + 8 * blk * 4               # compiler temporaries of the f32 chain
                + batch_tile * 128 * 4      # lane-partial accumulator scratch
                + 2 * 8 * 128 * 4)          # output slabs

    vocab_cap = 128
    for cand in (8192, 4096, 2048, 1024, 512, 256, 128):
        if _footprint(cand) + (1 << 20) <= budget:
            vocab_cap = cand
            break

    Vp0 = _round_up(V, 128)
    vt = _pick_tile(Vp0, vocab_cap, 128)
    if vt is not None and vt >= max(128, vocab_cap // 4):
        vocab_tile, Vp = vt, Vp0                  # zero-waste divisor tile
    else:
        vocab_tile = min(vocab_cap, Vp0)          # keep big tiles; pad the tail
        Vp = _round_up(Vp0, vocab_tile)

    need_row_mask = Bp != B
    need_col_mask = Vp != V
    if need_row_mask or need_col_mask:
        pad = ((0, Bp - B), (0, Vp - V))
        log_p = jnp.pad(log_p, pad)   # pad value 0.0 -> finite term, masked in-kernel
        log_q = jnp.pad(log_q, pad)

    nb = Bp // batch_tile
    nv = Vp // vocab_tile
    # Ensure >= 2 parallel blocks when possible so both v7x TensorCores are used.
    nv_outer = 2 if (nb == 1 and nv >= 2 and nv % 2 == 0) else 1
    nv_inner = nv // nv_outer

    kernel = _make_jsd_kernel(batch_tile, vocab_tile, nv_inner, B, V,
                              need_row_mask, need_col_mask)

    vmem_limit = int(min(vmem_cap, max(32 << 20, _footprint(vocab_tile) + (4 << 20))))

    cost = pl.CostEstimate(
        flops=10 * Bp * Vp,
        transcendentals=3 * Bp * Vp,  # 2x exp + 1x log per element (EUP ceiling on v7x)
        bytes_accessed=2 * Bp * Vp * itemsize + nb * nv_outer * 8 * 128 * 4,
    )

    in_spec = pl.BlockSpec((batch_tile, vocab_tile),
                           lambda i, o, k: (i, o * nv_inner + k))

    partials = pl.pallas_call(
        kernel,
        out_shape=jax.ShapeDtypeStruct((nb * nv_outer, 8, 128), jnp.float32),
        grid_spec=pltpu.PrefetchScalarGridSpec(
            num_scalar_prefetch=0,
            grid=(nb, nv_outer, nv_inner),
            in_specs=[in_spec, in_spec],
            out_specs=pl.BlockSpec((1, 8, 128),
                                   lambda i, o, k: (i * nv_outer + o, 0, 0)),
            scratch_shapes=[pltpu.VMEM((batch_tile, 128), jnp.float32)],
        ),
        compiler_params=pltpu.CompilerParams(
            dimension_semantics=("parallel", "parallel", "arbitrary"),
            vmem_limit_bytes=vmem_limit,
        ),
        cost_estimate=cost,
    )(log_p, log_q)

    # Tiny final cross-lane reduction + 'batchmean' normalization in plain JAX.
    return 0.5 * jnp.sum(partials) / jnp.float32(B)


def jsd_reference(log_p, log_q):
    lp = log_p.astype(jnp.float32)
    lq = log_q.astype(jnp.float32)
    p = jnp.exp(lp)
    q = jnp.exp(lq)
    m = 0.5 * (p + q + 1e-12)
    logm = jnp.log(m)
    total = jnp.sum(m * (2.0 * logm - lp - lq))
    return 0.5 * total / lp.shape[0]


if __name__ == "__main__":
    key = jax.random.PRNGKey(0)

    def make_inputs(k, B, V):
        k1, k2 = jax.random.split(k)
        lp = jax.nn.log_softmax(jax.random.normal(k1, (B, V), dtype=jnp.float32), axis=-1)
        lq = jax.nn.log_softmax(jax.random.normal(k2, (B, V), dtype=jnp.float32), axis=-1)
        return lp, lq

    # Case 1: small, tile-aligned (batch=8, vocab=256).
    # Case 2: ragged shape exercising the padded/masked path (batch=6, vocab=333).
    cases = [(8, 256), (6, 333)]
    keys = jax.random.split(key, len(cases))
    for kk, (B, V) in zip(keys, cases):
        lp, lq = make_inputs(kk, B, V)
        out = jax.block_until_ready(jsd_pallas(lp, lq))
        ref = jsd_reference(lp, lq)
        np.testing.assert_allclose(np.asarray(out), np.asarray(ref),
                                   rtol=1e-5, atol=1e-6)

    print("KERNEL_OK")
</pallas_src>

<mosaic_0001>
module attributes {stable_mosaic.version = 11 : i64} {
  func.func @kernel(%arg0: i32, %arg1: i32, %arg2: i32, %arg3: memref<8x256xf32, #tpu.memory_space<vmem>>, %arg4: memref<8x256xf32, #tpu.memory_space<vmem>>, %arg5: memref<1x8x128xf32, #tpu.memory_space<vmem>>, %arg6: memref<8x128xf32, #tpu.memory_space<vmem>>) attributes {dimension_semantics = [#tpu.dimension_semantics<parallel>, #tpu.dimension_semantics<parallel>, #tpu.dimension_semantics<arbitrary>], iteration_bounds = array<i64: 1, 1, 1>, scalar_prefetch = 0 : i64, scratch_operands = 1 : i64, tpu.core_type = #tpu.core_type<tc>, window_params = [{transform_indices = @transform_0, window_bounds = array<i64: 8, 256>}, {transform_indices = @transform_1, window_bounds = array<i64: 8, 256>}, {transform_indices = @transform_2, window_bounds = array<i64: 1, 8, 128>}]} {
    %c0_i32 = arith.constant 0 : i32
    %0 = arith.cmpi eq, %arg2, %c0_i32 : i32
    %1 = arith.extui %0 : i1 to i32
    %c0_i32_0 = arith.constant 0 : i32
    %2 = arith.cmpi ne, %1, %c0_i32_0 : i32
    scf.if %2 {
      %cst_12 = arith.constant 0.000000e+00 : f32
      %27 = vector.broadcast %cst_12 : f32 to vector<8x128xf32>
      %c0_13 = arith.constant 0 : index
      %c0_14 = arith.constant 0 : index
      %28 = vector.load %arg6[%c0_13, %c0_14] : memref<8x128xf32, #tpu.memory_space<vmem>>, vector<8x128xf32>
      tpu.vector_store %arg6[%c0_13, %c0_14], %27 {strides = array<i32>} : memref<8x128xf32, #tpu.memory_space<vmem>>, vector<8x128xf32>,
    } else {
    }
    %c0 = arith.constant 0 : index
    %c0_1 = arith.constant 0 : index
    %3 = vector.load %arg3[%c0, %c0_1] : memref<8x256xf32, #tpu.memory_space<vmem>>, vector<8x256xf32>
    %c0_2 = arith.constant 0 : index
    %c0_3 = arith.constant 0 : index
    %4 = vector.load %arg4[%c0_2, %c0_3] : memref<8x256xf32, #tpu.memory_space<vmem>>, vector<8x256xf32>
    %5 = math.exp %3 : vector<8x256xf32>
    %6 = math.exp %4 : vector<8x256xf32>
    %7 = arith.addf %5, %6 : vector<8x256xf32>
    %cst = arith.constant 9.99999996E-13 : f32
    %8 = vector.broadcast %cst : f32 to vector<8x256xf32>
    %9 = arith.addf %7, %8 : vector<8x256xf32>
    %cst_4 = arith.constant 5.000000e-01 : f32
    %10 = vector.broadcast %cst_4 : f32 to vector<8x256xf32>
    %11 = arith.mulf %10, %9 : vector<8x256xf32>
    %12 = math.log %11 : vector<8x256xf32>
    %cst_5 = arith.constant 2.000000e+00 : f32
    %13 = vector.broadcast %cst_5 : f32 to vector<8x256xf32>
    %14 = arith.mulf %13, %12 : vector<8x256xf32>
    %15 = arith.subf %14, %3 : vector<8x256xf32>
    %16 = arith.subf %15, %4 : vector<8x256xf32>
    %17 = arith.mulf %11, %16 : vector<8x256xf32>
    %18 = vector.extract_strided_slice %17 {offsets = [0, 0], sizes = [8, 128], strides = [1, 1]} : vector<8x256xf32> to vector<8x128xf32>
    %19 = vector.extract_strided_slice %17 {offsets = [0, 128], sizes = [8, 128], strides = [1, 1]} : vector<8x256xf32> to vector<8x128xf32>
    %20 = arith.addf %18, %19 : vector<8x128xf32>
    %c0_6 = arith.constant 0 : index
    %c0_7 = arith.constant 0 : index
    %21 = vector.load %arg6[%c0_6, %c0_7] : memref<8x128xf32, #tpu.memory_space<vmem>>, vector<8x128xf32>
    %22 = arith.addf %21, %20 : vector<8x128xf32>
    %c0_8 = arith.constant 0 : index
    %c0_9 = arith.constant 0 : index
    %23 = vector.load %arg6[%c0_8, %c0_9] : memref<8x128xf32, #tpu.memory_space<vmem>>, vector<8x128xf32>
    tpu.vector_store %arg6[%c0_8, %c0_9], %22 {strides = array<i32>} : memref<8x128xf32, #tpu.memory_space<vmem>>, vector<8x128xf32>,
    %c0_i32_10 = arith.constant 0 : i32
    %24 = arith.cmpi eq, %arg2, %c0_i32_10 : i32
    %25 = arith.extui %24 : i1 to i32
    %c0_i32_11 = arith.constant 0 : i32
    %26 = arith.cmpi ne, %25, %c0_i32_11 : i32
    scf.if %26 {
      %c0_12 = arith.constant 0 : index
      %c0_13 = arith.constant 0 : index
      %27 = vector.load %arg6[%c0_12, %c0_13] : memref<8x128xf32, #tpu.memory_space<vmem>>, vector<8x128xf32>
      %28 = vector.shape_cast %27 : vector<8x128xf32> to vector<1x8x128xf32>
      %c0_14 = arith.constant 0 : index
      %c0_15 = arith.constant 0 : index
      %c0_16 = arith.constant 0 : index
      %29 = vector.load %arg5[%c0_14, %c0_15, %c0_16] : memref<1x8x128xf32, #tpu.memory_space<vmem>>, vector<1x8x128xf32>
      tpu.vector_store %arg5[%c0_14, %c0_15, %c0_16], %28 {strides = array<i32>} : memref<1x8x128xf32, #tpu.memory_space<vmem>>, vector<1x8x128xf32>,
    } else {
    }
    return
  }
  func.func @transform_0(%arg0: i32, %arg1: i32, %arg2: i32) -> (i32, i32) {
    %c1_i32 = arith.constant 1 : i32
    %0 = arith.muli %arg1, %c1_i32 : i32
    %1 = arith.addi %0, %arg2 : i32
    %c0_i32 = arith.constant 0 : i32
    return %arg0, %1 : i32, i32
  }
  func.func @transform_1(%arg0: i32, %arg1: i32, %arg2: i32) -> (i32, i32) {
    %c1_i32 = arith.constant 1 : i32
    %0 = arith.muli %arg1, %c1_i32 : i32
    %1 = arith.addi %0, %arg2 : i32
    %c0_i32 = arith.constant 0 : i32
    return %arg0, %1 : i32, i32
  }
  func.func @transform_2(%arg0: i32, %arg1: i32, %arg2: i32) -> (i32, i32, i32) {
    %c1_i32 = arith.constant 1 : i32
    %0 = arith.muli %arg0, %c1_i32 : i32
    %1 = arith.addi %0, %arg1 : i32
    %c0_i32 = arith.constant 0 : i32
    %c0_i32_0 = arith.constant 0 : i32
    %c0_i32_1 = arith.constant 0 : i32
    return %1, %c0_i32, %c0_i32_0 : i32, i32, i32
  }
}

</mosaic_0001>

<bundles_post_ra>
// kernel: tpu_custom_call.1
= control target key start
LH: loop header
LB: loop body
LE: loop exit
PB: predicated region body
PF: predicated region fallthrough
CT: control target
= control target key end

     0   :  { %7 = vsyncpa [#allocation4], 0  ;;  %s253_s0 = inlined_call_operand.hbm [shape: f32[8,256], index: 0, kind: input, shape index: {}]   ;;  %s254_s1 = inlined_call_operand.hbm [shape: f32[8,256], index: 1, kind: input, shape index: {}]   ;;  %s255_s2 = inlined_call_operand.hbm [shape: f32[1,8,128], index: 2, kind: output, shape index: {}]  }
   0x1   :  { %8 = vsyncpa [#allocation7], 0 }
   0x2   :  { %9 = vsyncpa [#allocation5], 0  ;;  %s199_s9 = smov [#allocation3]   ;;  %s200_s11 = smov [#allocation6]  }
   0x3   :  { %s20_s10 = sshll.u32 %s199_s9, 4  ;;  %s34_s12 = sshll.u32 %s200_s11, 4  ;;  %s21_s10 = int_to_ptr.vmem [resolvable:$true] %s20_s10  ;;  %s35_s12 = int_to_ptr.vmem [resolvable:$true] %s34_s12 }
   0x4   :  { %s127_s15 = scalar_lea.hbm %s253_s0, 256 }
   0x5   :  { %p128_p0 = scmp.ne.s32.totalorder %s253_s0, %s127_s15  ;;  %p131_p1 = scmp.lt.u32.totalorder %s127_s15, %s253_s0 }
   0x7   :  { %p133_p2 = pnand %p131_p1, %p128_p0 }
   0x9   :  { %136 = shalt.err (!%p133_p2)
}
   0xa   :  { %s137_s20 = scalar_lea.vmem %s21_s10, 256  ;;  %p142_p4 = scmp.lt.s32.totalorder %s21_s10, %s21_s10 }
   0xb   :  { %p138_p3 = scmp.ne.s32.totalorder %s21_s10, %s137_s20  ;;  %p143_p5 = scmp.lt.s32.totalorder %s137_s20, %s137_s20 }
   0xd   :  { %p144_p6 = por %p143_p5, %p142_p4 }
   0xf   :  { %p145_p7 = pnand %p144_p6, %p138_p3 }
  0x11   :  { %148 = shalt.err (!%p145_p7)
}
  0x12   :  { %23 = dma.hbm_to_vmem [thread:$0]  %s253_s0, 256, %s21_s10, [#allocation4]  }
  0x13   :  { %s149_s25 = scalar_lea.hbm %s254_s1, 256 }
  0x14   :  { %p150_p8 = scmp.ne.s32.totalorder %s254_s1, %s149_s25  ;;  %p153_p9 = scmp.lt.u32.totalorder %s149_s25, %s254_s1 }
  0x16   :  { %p155_p10 = pnand %p153_p9, %p150_p8 }
  0x18   :  { %158 = shalt.err (!%p155_p10)
}
  0x19   :  { %s159_s30 = scalar_lea.vmem %s35_s12, 256  ;;  %p164_p12 = scmp.lt.s32.totalorder %s35_s12, %s35_s12 }
  0x1a   :  { %p160_p11 = scmp.ne.s32.totalorder %s35_s12, %s159_s30  ;;  %p165_p13 = scmp.lt.s32.totalorder %s159_s30, %s159_s30 }
  0x1c   :  { %p166_p0 = por %p165_p13, %p164_p12 }
  0x1e   :  { %p167_p1 = pnand %p166_p0, %p160_p11 }
  0x20   :  { %170 = shalt.err (!%p167_p1)
}
  0x21   :  { %37 = dma.hbm_to_vmem [thread:$0]  %s254_s1, 256, %s35_s12, [#allocation7]  }
  0x22   :  { %193 = dma.done.wait [#allocation4], 256  }
  0x23   :  { %194 = vsyncadd [#allocation4], 4294967040 }
  0x24   :  { %195 = dma.done.wait [#allocation7], 256  }
  0x25   :  { %196 = vsyncadd [#allocation7], 4294967040  ;;  %v54_v0 = vld [vmem:[#allocation3] sm:$0xff]  ;;  %v55_v1 = vld [vmem:[#allocation3 + $0x8] sm:$0xff]  ;;  %s201_s1 = smov [#allocation8]  }
  0x26   :  { %v56_v2 = vld [vmem:[#allocation6] sm:$0xff]  ;;  %v57_v3 = vld [vmem:[#allocation6 + $0x8] sm:$0xff]  ;;  %v58_v4 = vmul.f32 1.442695, %v54_v0  ;;  %v60_v5 = vmul.f32 1.442695, %v55_v1 }
  0x27   :  { %v62_v6 = vmul.f32 1.442695, %v56_v2  ;;  %v64_v7 = vmul.f32 1.442695, %v57_v3  ;;  %s102_s4 = sshll.u32 %s201_s1, 4  ;;  %s103_s4 = int_to_ptr.vmem [resolvable:$true] %s102_s4 }
  0x28   :  { %115 = vpow2.f32 %v58_v4  ;;  %s171_s5 = scalar_lea.vmem %s103_s4, 128  ;;  %p176_p3 = scmp.lt.s32.totalorder %s103_s4, %s103_s4 }
  0x29   :  { %117 = vpow2.f32 %v60_v5  ;;  %p172_p2 = scmp.ne.s32.totalorder %s103_s4, %s171_s5  ;;  %p177_p4 = scmp.lt.s32.totalorder %s171_s5, %s171_s5 }
  0x2a   :  { %119 = vpow2.f32 %v62_v6 }
  0x2b   :  { %121 = vpow2.f32 %v64_v7  ;;  %p178_p5 = por %p177_p4, %p176_p3 }
  0x2d   :  { %p179_p6 = pnand %p178_p5, %p172_p2 }
  0x32   :  { %v116_v8 = vpop.eup %115 }
  0x33   :  { %v118_v9 = vpop.eup %117 }
  0x34   :  { %v120_v10 = vpop.eup %119 }
  0x35   :  { %v122_v11 = vpop.eup %121  ;;  %v66_v12 = vadd.f32 %v120_v10, %v116_v8 }
  0x36   :  { %v67_v13 = vadd.f32 %v122_v11, %v118_v9 }
  0x37   :  { %v68_v14 = vadd.f32 1e-12, %v66_v12 }
  0x38   :  { %v69_v15 = vadd.f32 1e-12, %v67_v13 }
  0x39   :  { %v70_v16 = vmul.f32 0.5, %v68_v14 }
  0x3a   :  { %v71_v17 = vmul.f32 0.5, %v69_v15 }
  0x3b   :  { %123 = vlog2.f32 %v70_v16 }
  0x3c   :  { %125 = vlog2.f32 %v71_v17 }
  0x45   :  { %v124_v18 = vpop.eup %123 }
  0x46   :  { %v126_v19 = vpop.eup %125  ;;  %v73_v20 = vmul.f32 0.6931472, %v124_v18 }
  0x47   :  { %v75_v21 = vmul.f32 0.6931472, %v126_v19 }
  0x48   :  { %v76_v22 = vmul.f32 2.0, %v73_v20 }
  0x49   :  { %v77_v23 = vmul.f32 2.0, %v75_v21 }
  0x4a   :  { %v78_v24 = vsub.f32 %v76_v22, %v54_v0 }
  0x4b   :  { %v79_v25 = vsub.f32 %v77_v23, %v55_v1 }
  0x4c   :  { %v80_v26 = vsub.f32 %v78_v24, %v56_v2 }
  0x4d   :  { %v81_v27 = vsub.f32 %v79_v25, %v57_v3 }
  0x4e   :  { %v82_v28 = vmul.f32 %v80_v26, %v70_v16 }
  0x4f   :  { %v83_v29 = vmul.f32 %v81_v27, %v71_v17 }
  0x51   :  { %v84_v30 = vadd.f32 %v83_v29, %v82_v28 }
  0x53   :  { %92 = vst [vmem:[#allocation8] sm:$0xff] %v84_v30 }
  0x54   :  { %182 = shalt.err (!%p179_p6)
}
  0x55   :  { %s183_s8 = scalar_lea.hbm %s255_s2, 128 }
  0x56   :  { %p184_p7 = scmp.ne.s32.totalorder %s255_s2, %s183_s8  ;;  %p187_p8 = scmp.lt.u32.totalorder %s183_s8, %s255_s2 }
  0x58   :  { %p189_p9 = pnand %p187_p8, %p184_p7 }
  0x5a   :  { %192 = shalt.err (!%p189_p9)
}
  0x5b   :  { %105 = dma.vmem_to_hbm [thread:$0]  %s103_s4, 128, %s255_s2, [#allocation5]  }
  0x5c   :  { %197 = dma.done.wait [#allocation5], 128  }
  0x5d   :  { %198 = vsyncadd [#allocation5], 4294967168 }
  0x5e   :  { %109 = vsyncpa [#allocation4], 1 }
  0x5f   :  { %110 = vsyncpa [#allocation7], 1 }
  0x60   :  { %111 = vsyncpa [#allocation5], 1 }

</bundles_post_ra>
